<compile_context>
chip_gen: v7x
topology: tpu7x:2x2x1
jax: 0.10.0
libtpu: 0.0.40
codegen_flags: <defaults>
</compile_context>

<pallas_src>
import jax
import jax.numpy as jnp
from jax.experimental import pallas as pl
from jax.experimental.pallas import tpu as pltpu


def _copy_kernel(x_ref, o_ref):
    # Identity copy of the current block through VMEM.
    o_ref[...] = x_ref[...]


# Below this total size the whole tensor is copied as a single lane-dense
# (1, N) block with no grid. 2 MiB/block keeps in+out double buffers <= 8 MiB.
_SINGLE_BLOCK_BYTES = 2 * 1024 * 1024
# Combined VMEM budget for the tiled path (in + out, each double-buffered).
_TILED_VMEM_BUDGET = 8 * 1024 * 1024
_MAX_TILE_ROWS = 1024


def _as_lane_dense_2d(x):
    """Reshape to 2D with a lane-dense (wide) last dim; returns (x2d, orig_shape)."""
    orig_shape = x.shape
    total = x.size
    if x.ndim <= 1 or total * x.dtype.itemsize <= _SINGLE_BLOCK_BYTES:
        # Small enough for a single block: fully flatten so every vector
        # store uses all 128 lanes.
        return x.reshape(1, total), orig_shape
    rows = orig_shape[0]
    return x.reshape(rows, total // rows), orig_shape


def _choose_tile_rows(rows, cols, itemsize):
    row_bytes = cols * itemsize
    max_rows = _TILED_VMEM_BUDGET // (4 * row_bytes)  # in + out, double-buffered
    max_rows = max(8, min(max_rows, _MAX_TILE_ROWS))
    if rows <= max_rows:
        return rows
    return max(8, (max_rows // 8) * 8)  # (8,128) rule: tiled rows must be %8


def _identity_copy_2d(x2d):
    rows, cols = x2d.shape
    nbytes = x2d.size * x2d.dtype.itemsize
    cost = pl.CostEstimate(flops=0, transcendentals=0, bytes_accessed=2 * nbytes)

    tile = _choose_tile_rows(rows, cols, x2d.dtype.itemsize)
    if tile >= rows:
        # Single whole-array block, no grid: one DMA pair, output aliased
        # onto the input buffer.
        return pl.pallas_call(
            _copy_kernel,
            out_shape=jax.ShapeDtypeStruct(x2d.shape, x2d.dtype),
            input_output_aliases={0: 0},
            cost_estimate=cost,
        )(x2d)

    # Large case: tile the leading axis; last dim is the full (lane-dense)
    # width, so the (8,128) block rule is satisfied for any column count.
    grid = (pl.cdiv(rows, tile),)
    spec = pl.BlockSpec((tile, cols), lambda i: (i, 0))
    return pl.pallas_call(
        _copy_kernel,
        out_shape=jax.ShapeDtypeStruct(x2d.shape, x2d.dtype),
        grid=grid,
        in_specs=[spec],
        out_specs=spec,
        input_output_aliases={0: 0},
        compiler_params=pltpu.CompilerParams(
            dimension_semantics=("parallel",)),
        cost_estimate=cost,
    )(x2d)


def sa_weights_forward(ic_params, f_params):
    """Pallas equivalent of SAWeights.forward(): returns (ic_params, f_params)."""
    ic2d, ic_shape = _as_lane_dense_2d(ic_params)
    f2d, f_shape = _as_lane_dense_2d(f_params)
    ic_out = _identity_copy_2d(ic2d).reshape(ic_shape)
    f_out = _identity_copy_2d(f2d).reshape(f_shape)
    return ic_out, f_out


def init_sa_weights(dims, nx, nt, sub_x, sub_t, dtype=jnp.float32):
    """Deterministic parameter init matching SAWeights.__init__ (torch.ones)."""
    if dims == 4:
        ic_params = jnp.ones((nx // sub_x, nx // sub_x), dtype=dtype)
        f_params = jnp.ones((nx // sub_x, nx // sub_x, (nt - 1) // sub_t), dtype=dtype)
    else:
        ic_params = jnp.ones((nx // sub_x,), dtype=dtype)
        f_params = jnp.ones(((nt - 1) // sub_t, nx // sub_x), dtype=dtype)
    return ic_params, f_params


if __name__ == "__main__":
    # PRNGKey created for reproducibility of the harness; the module's
    # parameters are deterministically ones per its __init__, and forward()
    # takes no data inputs.
    key = jax.random.PRNGKey(0)
    del key

    # dims == 4 path: nx=16, nt=9, sub_x=1, sub_t=1
    #   -> ic_params: (16, 16), f_params: (16, 16, 8)
    dims, nx, nt, sub_x, sub_t = 4, 16, 9, 1, 1
    ic_params, f_params = init_sa_weights(dims, nx, nt, sub_x, sub_t)
    ic_out, f_out = sa_weights_forward(ic_params, f_params)
    jax.block_until_ready((ic_out, f_out))

    assert ic_out.shape == (nx // sub_x, nx // sub_x)
    assert f_out.shape == (nx // sub_x, nx // sub_x, (nt - 1) // sub_t)
    assert jnp.allclose(ic_out, ic_params)
    assert jnp.allclose(f_out, f_params)

    # dims != 4 path: ic_params: (16,), f_params: (8, 16)
    ic_params2, f_params2 = init_sa_weights(3, nx, nt, sub_x, sub_t)
    ic_out2, f_out2 = sa_weights_forward(ic_params2, f_params2)
    jax.block_until_ready((ic_out2, f_out2))

    assert ic_out2.shape == (nx // sub_x,)
    assert f_out2.shape == ((nt - 1) // sub_t, nx // sub_x)
    assert jnp.allclose(ic_out2, ic_params2)
    assert jnp.allclose(f_out2, f_params2)

    print("KERNEL_OK")
</pallas_src>

<mosaic_0001>
module attributes {stable_mosaic.version = 11 : i64} {
  func.func @_copy_kernel(%arg0: memref<1x256xf32, #tpu.memory_space<vmem>>, %arg1: memref<1x256xf32, #tpu.memory_space<vmem>>) attributes {dimension_semantics = [], scalar_prefetch = 0 : i64, scratch_operands = 0 : i64, tpu.core_type = #tpu.core_type<tc>} {
    %c0 = arith.constant 0 : index
    %c0_0 = arith.constant 0 : index
    %0 = vector.load %arg0[%c0, %c0_0] : memref<1x256xf32, #tpu.memory_space<vmem>>, vector<1x256xf32>
    %c0_1 = arith.constant 0 : index
    %c0_2 = arith.constant 0 : index
    %1 = vector.load %arg1[%c0_1, %c0_2] : memref<1x256xf32, #tpu.memory_space<vmem>>, vector<1x256xf32>
    tpu.vector_store %arg1[%c0_1, %c0_2], %0 {strides = array<i32>} : memref<1x256xf32, #tpu.memory_space<vmem>>, vector<1x256xf32>,
    return
  }
}

</mosaic_0001>

<bundles_post_ra>
// kernel: tpu_custom_call.1
= control target key start
LH: loop header
LB: loop body
LE: loop exit
PB: predicated region body
PF: predicated region fallthrough
CT: control target
= control target key end

     0   :  { %6 = vsyncpa [#allocation3], 0  ;;  %s128_s0 = inlined_call_operand.hbm [shape: f32[1,256], index: 0, kind: input, shape index: {}, may-alias: {0,1}]   ;;  %s129_s1 = inlined_call_operand.hbm [shape: f32[1,256], index: 1, kind: output, shape index: {}, may-alias: {0,1}]  }
   0x1   :  { %7 = vsyncpa [#allocation4], 0  ;;  %s92_s6 = smov [#allocation2]   ;;  %s44_s10 = scalar_lea.hbm %s128_s0, 32 }
   0x2   :  { %s14_s7 = sshll.u32 %s92_s6, 4  ;;  %p45_p0 = scmp.ne.s32.totalorder %s128_s0, %s44_s10  ;;  %s15_s7 = int_to_ptr.vmem [resolvable:$true] %s14_s7 }
   0x3   :  { %p48_p1 = scmp.lt.u32.totalorder %s44_s10, %s128_s0 }
   0x5   :  { %p50_p2 = pnand %p48_p1, %p45_p0 }
   0x7   :  { %53 = shalt.err (!%p50_p2)
}
   0x8   :  { %s54_s15 = scalar_lea.vmem %s15_s7, 32  ;;  %p59_p4 = scmp.lt.s32.totalorder %s15_s7, %s15_s7 }
   0x9   :  { %p55_p3 = scmp.ne.s32.totalorder %s15_s7, %s54_s15  ;;  %p60_p5 = scmp.lt.s32.totalorder %s54_s15, %s54_s15 }
   0xb   :  { %p61_p6 = por %p60_p5, %p59_p4 }
   0xd   :  { %p62_p7 = pnand %p61_p6, %p55_p3 }
   0xf   :  { %65 = shalt.err (!%p62_p7)
}
  0x10   :  { %17 = dma.hbm_to_vmem [thread:$0]  %s128_s0, 32, %s15_s7, [#allocation3]  }
  0x11   :  { %88 = dma.done.wait [#allocation3], 32  }
  0x12   :  { %89 = vsyncadd [#allocation3], 4294967264  ;;  %v22_v0 = vlaneseq  ;;  %s93_s18 = smov [#allocation5]   ;;  %v21_v1 = vld [vmem:[#allocation2] sm:$0x3] }
  0x13   :  { %s33_s19 = sshll.u32 %s93_s18, 4  ;;  %s34_s19 = int_to_ptr.vmem [resolvable:$true] %s33_s19 }
  0x14   :  { %vm24_vm0 = vcmp.lt.s32.totalorder %v22_v0, 256  ;;  %s66_s20 = scalar_lea.vmem %s34_s19, 32  ;;  %p71_p9 = scmp.lt.s32.totalorder %s34_s19, %s34_s19 }
  0x15   :  { %26 = vst.msk [vmem:[#allocation5] sm:$0x3] %vm24_vm0, %v21_v1  ;;  %p67_p8 = scmp.ne.s32.totalorder %s34_s19, %s66_s20  ;;  %p72_p10 = scmp.lt.s32.totalorder %s66_s20, %s66_s20 }
  0x17   :  { %p73_p11 = por %p72_p10, %p71_p9 }
  0x19   :  { %p74_p12 = pnand %p73_p11, %p67_p8 }
  0x1b   :  { %77 = shalt.err (!%p74_p12)
}
  0x1c   :  { %s78_s0 = scalar_lea.hbm %s129_s1, 32 }
  0x1d   :  { %p79_p13 = scmp.ne.s32.totalorder %s129_s1, %s78_s0  ;;  %p82_p0 = scmp.lt.u32.totalorder %s78_s0, %s129_s1 }
  0x1f   :  { %p84_p1 = pnand %p82_p0, %p79_p13 }
  0x21   :  { %87 = shalt.err (!%p84_p1)
}
  0x22   :  { %36 = dma.vmem_to_hbm [thread:$0]  %s34_s19, 32, %s129_s1, [#allocation4]  }
  0x23   :  { %90 = dma.done.wait [#allocation4], 32  }
  0x24   :  { %91 = vsyncadd [#allocation4], 4294967264 }
  0x25   :  { %40 = vsyncpa [#allocation3], 1 }
  0x26   :  { %41 = vsyncpa [#allocation4], 1 }

</bundles_post_ra>
